<compile_context>
chip_gen: v6e
topology: v6e:2x2x1
jax: 0.10.0
libtpu: 0.0.40
codegen_flags: <defaults>
</compile_context>

<pallas_src>
import functools

import jax
import jax.numpy as jnp
from jax.experimental import pallas as pl
from jax.experimental.pallas import tpu as pltpu


def _round_up(x, m):
    return pl.cdiv(x, m) * m


def _rope_kernel_split(pos_ref, inv_ref, cos_ref, sin_ref, *, half, scaling):
    # pos_ref: [TILE_N, 1] f32 positions, inv_ref: [1, H] f32 inv freqs
    # cos_ref/sin_ref: [TILE_N, 2*H] in the output dtype.
    freqs = pos_ref[...] * inv_ref[...]          # [TILE_N, H] (VPU broadcast-mul)
    c = jnp.cos(freqs)
    s = jnp.sin(freqs)
    if scaling != 1.0:
        c = c * scaling
        s = s * scaling
    c = c.astype(cos_ref.dtype)
    s = s.astype(sin_ref.dtype)
    # Duplicate along the last axis: emb = cat([freqs, freqs], -1) layout.
    cos_ref[:, 0:half] = c
    cos_ref[:, half:2 * half] = c
    sin_ref[:, 0:half] = s
    sin_ref[:, half:2 * half] = s


def _rope_kernel_packed(pos_ref, inv_ref, out_ref, *, half, scaling):
    # out_ref: [TILE_N, 4*H]; lanes [0, 2H) = cos, lanes [2H, 4H) = sin.
    freqs = pos_ref[...] * inv_ref[...]          # [TILE_N, H]
    c = jnp.cos(freqs)
    s = jnp.sin(freqs)
    if scaling != 1.0:
        c = c * scaling
        s = s * scaling
    c = c.astype(out_ref.dtype)
    s = s.astype(out_ref.dtype)
    out_ref[:, 0 * half:1 * half] = c
    out_ref[:, 1 * half:2 * half] = c
    out_ref[:, 2 * half:3 * half] = s
    out_ref[:, 3 * half:4 * half] = s


def qwen2_rotary_embedding(x, position_ids, inv_freq, attention_scaling=1.0,
                           *, tile_n=2048):
    """JAX/Pallas equivalent of Qwen2RotaryEmbedding.forward (rope_type='default')."""
    B, S = position_ids.shape
    half = int(inv_freq.shape[0])
    dim = 2 * half
    out_dtype = x.dtype

    # Flatten the token axis and pad to a sublane-friendly tile multiple.
    n_tokens = B * S
    tile = int(min(tile_n, _round_up(n_tokens, 8)))
    tile = int(_round_up(tile, 8))
    n_pad = int(_round_up(n_tokens, tile))

    pos = position_ids.reshape(n_tokens).astype(jnp.float32)
    if n_pad != n_tokens:
        pos = jnp.pad(pos, (0, n_pad - n_tokens))
    pos = pos.reshape(n_pad, 1)                              # [N_pad, 1]
    inv_2d = inv_freq.astype(jnp.float32).reshape(1, half)   # [1, H]

    grid = (n_pad // tile,)
    in_specs = [
        pl.BlockSpec((tile, 1), lambda i: (i, 0)),
        pl.BlockSpec((1, half), lambda i: (0, 0)),   # resident across all steps
    ]
    cparams = pltpu.CompilerParams(
        dimension_semantics=("parallel",),           # token axis is independent
        vmem_limit_bytes=32 << 20,
    )

    if dim % 128 == 0:
        # Already lane-dense: two separate [TILE_N, dim] outputs.
        kernel = functools.partial(_rope_kernel_split, half=half,
                                   scaling=float(attention_scaling))
        cos_flat, sin_flat = pl.pallas_call(
            kernel,
            grid=grid,
            in_specs=in_specs,
            out_specs=(pl.BlockSpec((tile, dim), lambda i: (i, 0)),
                       pl.BlockSpec((tile, dim), lambda i: (i, 0))),
            out_shape=(jax.ShapeDtypeStruct((n_pad, dim), out_dtype),
                       jax.ShapeDtypeStruct((n_pad, dim), out_dtype)),
            compiler_params=cparams,
        )(pos, inv_2d)
    else:
        # Pack cos|sin into one slab so the HBM store is wider / lane-dense.
        kernel = functools.partial(_rope_kernel_packed, half=half,
                                   scaling=float(attention_scaling))
        packed = pl.pallas_call(
            kernel,
            grid=grid,
            in_specs=in_specs,
            out_specs=pl.BlockSpec((tile, 2 * dim), lambda i: (i, 0)),
            out_shape=jax.ShapeDtypeStruct((n_pad, 2 * dim), out_dtype),
            compiler_params=cparams,
        )(pos, inv_2d)
        cos_flat = packed[:, :dim]
        sin_flat = packed[:, dim:]

    cos = cos_flat[:n_tokens].reshape(B, S, dim)
    sin = sin_flat[:n_tokens].reshape(B, S, dim)
    return cos, sin


def _make_inv_freq(dim, base=10000.0):
    # _compute_default_rope_parameters: 1 / base ** (arange(0, dim, 2) / dim)
    exponents = jnp.arange(0, dim, 2, dtype=jnp.float32) / float(dim)
    return 1.0 / (base ** exponents)  # [dim // 2]


if __name__ == "__main__":
    key = jax.random.PRNGKey(0)

    # Small, module-consistent shapes.
    batch = 2
    seq = 8
    hidden = 32      # x's last dim (only its dtype matters to forward)
    base = 10000.0
    attention_scaling = 1.0  # 'default' rope -> attention_factor == 1.0

    x = jax.random.normal(key, (batch, seq, hidden), dtype=jnp.bfloat16)
    position_ids = jnp.broadcast_to(jnp.arange(seq, dtype=jnp.int32),
                                    (batch, seq))

    # head_dim=64 exercises the packed lane-dense path,
    # head_dim=128 exercises the split (already lane-dense) path.
    for head_dim in (64, 128):
        inv_freq = _make_inv_freq(head_dim, base=base)
        cos, sin = qwen2_rotary_embedding(x, position_ids, inv_freq,
                                          attention_scaling)
        jax.block_until_ready((cos, sin))

        # Pure-JAX reference.
        freqs_ref = (position_ids.astype(jnp.float32)[:, :, None]
                     * inv_freq[None, None, :])
        emb_ref = jnp.concatenate([freqs_ref, freqs_ref], axis=-1)
        cos_ref = (jnp.cos(emb_ref) * attention_scaling).astype(x.dtype)
        sin_ref = (jnp.sin(emb_ref) * attention_scaling).astype(x.dtype)

        assert cos.shape == (batch, seq, head_dim) and cos.dtype == x.dtype
        assert sin.shape == (batch, seq, head_dim) and sin.dtype == x.dtype
        assert jnp.allclose(cos.astype(jnp.float32),
                            cos_ref.astype(jnp.float32),
                            atol=1e-2, rtol=1e-2)
        assert jnp.allclose(sin.astype(jnp.float32),
                            sin_ref.astype(jnp.float32),
                            atol=1e-2, rtol=1e-2)

    print("KERNEL_OK")
</pallas_src>

<mosaic_0001>
module attributes {stable_mosaic.version = 11 : i64} {
  func.func @_rope_kernel_packed(%arg0: i32, %arg1: memref<16x1xf32, #tpu.memory_space<vmem>>, %arg2: memref<1x32xf32, #tpu.memory_space<vmem>>, %arg3: memref<16x128xbf16, #tpu.memory_space<vmem>>) attributes {dimension_semantics = [#tpu.dimension_semantics<parallel>], iteration_bounds = array<i64: 1>, scalar_prefetch = 0 : i64, scratch_operands = 0 : i64, tpu.core_type = #tpu.core_type<tc>, window_params = [{transform_indices = @transform_0, window_bounds = array<i64: 16, 1>}, {pipeline_mode = #tpu.pipeline_mode<synchronous>, transform_indices = @transform_1, window_bounds = array<i64: 1, 32>}, {transform_indices = @transform_2, window_bounds = array<i64: 16, 128>}]} {
    %c0 = arith.constant 0 : index
    %c0_0 = arith.constant 0 : index
    %0 = vector.load %arg1[%c0, %c0_0] : memref<16x1xf32, #tpu.memory_space<vmem>>, vector<16x1xf32>
    %c0_1 = arith.constant 0 : index
    %c0_2 = arith.constant 0 : index
    %1 = vector.load %arg2[%c0_1, %c0_2] : memref<1x32xf32, #tpu.memory_space<vmem>>, vector<1x32xf32>
    %2 = vector.broadcast %0 : vector<16x1xf32> to vector<16x32xf32>
    %3 = vector.broadcast %1 : vector<1x32xf32> to vector<16x32xf32>
    %4 = arith.mulf %2, %3 : vector<16x32xf32>
    %5 = math.cos %4 : vector<16x32xf32>
    %6 = math.sin %4 : vector<16x32xf32>
    %7 = arith.truncf %5 : vector<16x32xf32> to vector<16x32xbf16>
    %8 = arith.truncf %6 : vector<16x32xf32> to vector<16x32xbf16>
    %c0_3 = arith.constant 0 : index
    %c0_4 = arith.constant 0 : index
    %9 = vector.load %arg3[%c0_3, %c0_4] : memref<16x128xbf16, #tpu.memory_space<vmem>>, vector<16x32xbf16>
    tpu.vector_store %arg3[%c0_3, %c0_4], %7 {strides = array<i32>} : memref<16x128xbf16, #tpu.memory_space<vmem>>, vector<16x32xbf16>,
    %c0_5 = arith.constant 0 : index
    %c32 = arith.constant 32 : index
    %10 = vector.load %arg3[%c0_5, %c32] : memref<16x128xbf16, #tpu.memory_space<vmem>>, vector<16x32xbf16>
    tpu.vector_store %arg3[%c0_5, %c32], %7 {strides = array<i32>} : memref<16x128xbf16, #tpu.memory_space<vmem>>, vector<16x32xbf16>,
    %c0_6 = arith.constant 0 : index
    %c64 = arith.constant 64 : index
    %11 = vector.load %arg3[%c0_6, %c64] : memref<16x128xbf16, #tpu.memory_space<vmem>>, vector<16x32xbf16>
    tpu.vector_store %arg3[%c0_6, %c64], %8 {strides = array<i32>} : memref<16x128xbf16, #tpu.memory_space<vmem>>, vector<16x32xbf16>,
    %c0_7 = arith.constant 0 : index
    %c96 = arith.constant 96 : index
    %12 = vector.load %arg3[%c0_7, %c96] : memref<16x128xbf16, #tpu.memory_space<vmem>>, vector<16x32xbf16>
    tpu.vector_store %arg3[%c0_7, %c96], %8 {strides = array<i32>} : memref<16x128xbf16, #tpu.memory_space<vmem>>, vector<16x32xbf16>,
    return
  }
  func.func @transform_0(%arg0: i32) -> (i32, i32) {
    %c0_i32 = arith.constant 0 : i32
    %c0_i32_0 = arith.constant 0 : i32
    return %arg0, %c0_i32 : i32, i32
  }
  func.func @transform_1(%arg0: i32) -> (i32, i32) {
    %c0_i32 = arith.constant 0 : i32
    %c0_i32_0 = arith.constant 0 : i32
    %c0_i32_1 = arith.constant 0 : i32
    return %c0_i32, %c0_i32_0 : i32, i32
  }
  func.func @transform_2(%arg0: i32) -> (i32, i32) {
    %c0_i32 = arith.constant 0 : i32
    %c0_i32_0 = arith.constant 0 : i32
    return %arg0, %c0_i32 : i32, i32
  }
}

</mosaic_0001>

<bundles_post_ra>
// kernel: tpu_custom_call.1
= control target key start
LH: loop header
LB: loop body
LE: loop exit
PB: predicated region body
PF: predicated region fallthrough
CT: control target
= control target key end

     0   :  { %v583_v1 = vmov 0   ;;  %s688_s0 = inlined_call_operand.vmem [shape: f32[16,1], index: 0, kind: input, shape index: {}]   ;;  %s689_s1 = inlined_call_operand.vmem [shape: f32[1,32], index: 1, kind: input, shape index: {}]   ;;  %s690_s2 = inlined_call_operand.hbm [shape: bf16[16,128], index: 2, kind: output, shape index: {}]  }
   0x1   :  { %v12_v0 = vld [vmem:[%s688_s0] sm:$0xff]  ;;  %552 = vset.pattern.permute.xlu0 %v583_v1  ;;  %v13_v2 = vld [vmem:[%s688_s0 + $0x8] sm:$0xff] }
   0x2   :  { %17 = vperm.xlu0 %552, %v12_v0  }
   0x3   :  { %7 = vsyncpa [#allocation3], 0  ;;  %v507_v3 = vld [vmem:[%s689_s1] ss:$0 sm:$0xff]  ;;  %v584_v24 = vmov 683565275  }
   0x4   :  { %v585_v28 = vmov 2475754826   ;;  %v586_v30 = vmov 2131351028   ;;  %v587_v32 = vmov 2102212464  }
   0x5   :  { %v588_v34 = vmov 920167782   ;;  %v589_v41 = vmov 1326507024   ;;  %s590_s0 = smov 64   ;;  %s591_s1 = smov 32  }
   0x6   :  { %22 = vperm.xlu0 %552, %v13_v2   ;;  %s592_s15 = smov 96   ;;  %s593_s16 = smov [#allocation2]  }
   0x7   :  { %s496_s17 = sshll.u32 %s593_s16, 4  ;;  %s497_s17 = int_to_ptr.vmem [resolvable:$true] %s496_s17 }
   0x8   :  { %s561_s18 = scalar_lea.vmem %s497_s17, 128  ;;  %p566_p1 = scmp.lt.s32.totalorder %s497_s17, %s497_s17 }
   0x9   :  { %p562_p0 = scmp.ne.s32.totalorder %s497_s17, %s561_s18  ;;  %p567_p2 = scmp.lt.s32.totalorder %s561_s18, %s561_s18 }
   0xb   :  { %p568_p3 = por %p567_p2, %p566_p1 }
   0xd   :  { %p569_p4 = pnand %p568_p3, %p562_p0 }
  0x7d   :  { %v18_v4 = vpop.permute.xlu0 %17 }
  0x7e   :  { %v619_v5 = vmul.f32 %v507_v3, %v18_v4 }
  0x80   :  { %v33_v6 = vand.u32 2147483647, %v619_v5  ;;  %v36_v7 = vand.u32 2139095040, %v619_v5  ;;  %vm35_vm14 = vcmp.lt.s32.totalorder %v619_v5, 0 }
  0x81   :  { %v23_v8 = vpop.permute.xlu0 %22 }
  0x82   :  { %v37_v9 = vshrl.u32 %v36_v7, 23  ;;  %v623_v10 = vmul.f32 %v507_v3, %v23_v8  ;;  %v40_v11 = vand.u32 8388607, %v33_v6  ;;  %vm34_vm15 = vcmp.le.f32.partialorder %v33_v6, 0.7853982 }
  0x84   :  { %v508_v12 = vadd.s32 4294967169, %v37_v9  ;;  %v139_v13 = vand.u32 2139095040, %v623_v10  ;;  %v41_v15 = vor.u32 8388608, %v40_v11  ;;  %v136_v17 = vand.u32 2147483647, %v623_v10 }
  0x86   :  { %v43_v14 = vadd.s32 1, %v508_v12  ;;  %v140_v16 = vshrl.u32 %v139_v13, 23  ;;  %v629_v22 = vshll.u32 %v41_v15, 8  ;;  %v143_v26 = vand.u32 8388607, %v136_v17 }
  0x88   :  { %vm44_vm0 = vcmp.gt.s32.totalorder %v43_v14, 0  ;;  %v512_v19 = vadd.s32 4294967169, %v140_v16  ;;  %v144_v56 = vor.u32 8388608, %v143_v26 }
  0x89   :  { %v45_v18 = vsel %vm44_vm0, %v43_v14, 0  ;;  %vm138_vm0 = vcmp.lt.s32.totalorder %v623_v10, 0 }
  0x8a   :  { %v46_v20 = vshrl.u32 %v45_v18, 5  ;;  %v47_v21 = vand.u32 31, %v45_v18  ;;  %v146_v27 = vadd.s32 1, %v512_v19  ;;  %v184_v7 = vshll.u32 %v144_v56, 8 }
  0x8c   :  { %v48_v23 = vsub.s32 32, %v47_v21  ;;  %v50_v25 = vshll.u32 %v584_v24, %v47_v21  ;;  %v53_v29 = vshll.u32 %v585_v28, %v47_v21  ;;  %v56_v31 = vshll.u32 %v586_v30, %v47_v21 }
  0x8d   :  { %v59_v33 = vshll.u32 %v587_v32, %v47_v21  ;;  %v62_v35 = vshll.u32 %v588_v34, %v47_v21  ;;  %vm65_vm1 = vcmp.lt.s32.totalorder %v46_v20, 1  ;;  %vm67_vm2 = vcmp.lt.s32.totalorder %v46_v20, 3 }
  0x8e   :  { %v51_v36 = vshrl.u32 %v585_v28, %v48_v23  ;;  %v54_v37 = vshrl.u32 %v586_v30, %v48_v23  ;;  %v57_v38 = vshrl.u32 %v587_v32, %v48_v23  ;;  %v49_v39 = vshrl.u32 %v584_v24, %v48_v23 }
  0x8f   :  { %v60_v40 = vshrl.u32 %v588_v34, %v48_v23  ;;  %v63_v42 = vshrl.u32 %v589_v41, %v48_v23  ;;  %vm147_vm3 = vcmp.gt.s32.totalorder %v146_v27, 0  ;;  %vm68_vm4 = vcmp.lt.s32.totalorder %v46_v20, 4 }
  0x90   :  { %v52_v43 = vor.u32 %v51_v36, %v50_v25  ;;  %v55_v44 = vor.u32 %v54_v37, %v53_v29  ;;  %v58_v45 = vor.u32 %v57_v38, %v56_v31  ;;  %v148_v48 = vsel %vm147_vm3, %v146_v27, 0 }
  0x91   :  { %v61_v46 = vor.u32 %v60_v40, %v59_v33  ;;  %v64_v47 = vor.u32 %v63_v42, %v62_v35  ;;  %vm66_vm5 = vcmp.lt.s32.totalorder %v46_v20, 2  ;;  %v150_v59 = vand.u32 31, %v148_v48 }
  0x92   :  { %v69_v49 = vsel %vm65_vm1, %v49_v39, %v52_v43  ;;  %v70_v50 = vsel %vm68_vm4, %v58_v45, 2102212464  ;;  %v73_v51 = vsel %vm65_vm1, %v52_v43, %v55_v44  ;;  %v77_v52 = vsel %vm65_vm1, %v55_v44, %v58_v45 }
  0x93   :  { %v71_v53 = vsel %vm67_vm2, %v55_v44, %v70_v50  ;;  %v74_v54 = vsel %vm68_vm4, %v61_v46, 920167782  ;;  %v78_v55 = vsel %vm68_vm4, %v64_v47, 1326507024  ;;  %v149_v3 = vshrl.u32 %v148_v48, 5 }
  0x94   :  { %v75_v57 = vsel %vm67_vm2, %v58_v45, %v74_v54  ;;  %v79_v58 = vsel %vm67_vm2, %v61_v46, %v78_v55  ;;  %v72_v60 = vsel %vm66_vm5, %v69_v49, %v71_v53  ;;  %v151_v4 = vsub.s32 32, %v150_v59 }
  0x95   :  { %v76_v61 = vsel %vm66_vm5, %v73_v51, %v75_v57  ;;  %v80_v62 = vsel %vm66_vm5, %v77_v52, %v79_v58  ;;  %v88_v8 = vmul.u32 %v629_v22, %v72_v60  ;;  %v153_v9 = vshll.u32 %v584_v24, %v150_v59 }
  0x96   :  { %v642_v63 = vmul.u32.u64.low %v629_v22, %v80_v62  ;;  %v643_v0 = vmul.u32.u64.high %v629_v22, %v80_v62, %v642_v63  ;;  %v646_v1 = vmul.u32.u64.low %v629_v22, %v76_v61  ;;  %v647_v2 = vmul.u32.u64.high %v629_v22, %v76_v61, %v646_v1 }
  0x97   :  { %v156_v11 = vshll.u32 %v585_v28, %v150_v59  ;;  %v159_v12 = vshll.u32 %v586_v30, %v150_v59  ;;  %v154_v13 = vshrl.u32 %v585_v28, %v151_v4  ;;  %v157_v14 = vshrl.u32 %v586_v30, %v151_v4 }
  0x98   :  { %v160_v15 = vshrl.u32 %v587_v32, %v151_v4  ;;  %v162_v16 = vshll.u32 %v587_v32, %v150_v59  ;;  %vm90_vm6 = vc.u32 %v643_v0, %v646_v1  ;;  %v91_v18 = vadd.s32 1, %v647_v2 }
  0x99   :  { %v163_v19 = vshrl.u32 %v588_v34, %v151_v4  ;;  %v165_v20 = vshll.u32 %v588_v34, %v150_v59  ;;  %v155_v21 = vor.u32 %v154_v13, %v153_v9  ;;  %v158_v23 = vor.u32 %v157_v14, %v156_v11 }
  0x9a   :  { %v161_v25 = vor.u32 %v160_v15, %v159_v12  ;;  %v166_v26 = vshrl.u32 %v589_v41, %v151_v4  ;;  %v92_v22 = vsel %vm90_vm6, %v91_v18, %v647_v2  ;;  %vm168_vm7 = vcmp.lt.s32.totalorder %v149_v3, 1 }
  0x9b   :  { %v164_v27 = vor.u32 %v163_v19, %v162_v16  ;;  %vm171_vm8 = vcmp.lt.s32.totalorder %v149_v3, 4  ;;  %v93_v28 = vadd.s32 %v92_v22, %v88_v8  ;;  %vm170_vm9 = vcmp.lt.s32.totalorder %v149_v3, 3 }
  0x9c   :  { %v167_v29 = vor.u32 %v166_v26, %v165_v20  ;;  %v173_v30 = vsel %vm171_vm8, %v161_v25, 2102212464  ;;  %v152_v31 = vshrl.u32 %v584_v24, %v151_v4  ;;  %v176_v32 = vsel %vm168_vm7, %v155_v21, %v158_v23 }
  0x9d   :  { %v177_v33 = vsel %vm171_vm8, %v164_v27, 920167782  ;;  %v180_v35 = vsel %vm168_vm7, %v158_v23, %v161_v25  ;;  %v94_v36 = vadd.s32 536870912, %v93_v28  ;;  %vm169_vm10 = vcmp.lt.s32.totalorder %v149_v3, 2 }
  0x9e   :  { %v178_v34 = vsel %vm170_vm9, %v161_v25, %v177_v33  ;;  %v181_v37 = vsel %vm171_vm8, %v167_v29, 1326507024  ;;  %v172_v38 = vsel %vm168_vm7, %v152_v31, %v155_v21  ;;  %v174_v39 = vsel %vm170_vm9, %v158_v23, %v173_v30 }
  0x9f   :  { %v179_v40 = vsel %vm169_vm10, %v176_v32, %v178_v34  ;;  %v182_v41 = vsel %vm170_vm9, %v164_v27, %v181_v37  ;;  %v95_v42 = vshrl.u32 %v94_v36, 30  ;;  %v175_v48 = vsel %vm169_vm10, %v172_v38, %v174_v39 }
  0xa0   :  { %v183_v43 = vsel %vm169_vm10, %v180_v35, %v182_v41  ;;  %v657_v44 = vmul.u32.u64.low %v184_v7, %v179_v40  ;;  %v658_v45 = vmul.u32.u64.high %v184_v7, %v179_v40, %v657_v44  ;;  %v191_v51 = vmul.u32 %v184_v7, %v175_v48 }
  0xa1   :  { %v660_v46 = vmul.u32.u64.low %v184_v7, %v183_v43  ;;  %v661_v47 = vmul.u32.u64.high %v184_v7, %v183_v43, %v660_v46  ;;  %v96_v24 = vshll.u32 %v95_v42, 30  ;;  %v89_v63 = vadd.s32 %v646_v1, %v643_v0 }
  0xa2   :  { %v194_v50 = vadd.s32 1, %v658_v45  ;;  %vm137_vm1 = vcmp.le.f32.partialorder %v136_v17, 0.7853982  ;;  %vm125_vm8 = vweird.f32 %v619_v5  ;;  %vm456_vm9 = vcmask 257024  }
  0xa3   :  { %v97_v49 = vsub.s32 %v93_v28, %v96_v24  ;;  %vm193_vm11 = vc.u32 %v661_v47, %v657_v44  ;;  %v192_v23 = vadd.s32 %v657_v44, %v661_v47  ;;  %v119_v28 = vsub.s32 4, %v95_v42 }
  0xa4   :  { %v195_v53 = vsel %vm193_vm11, %v194_v50, %v658_v45 }
  0xa5   :  { %v99_v52 = vsub.s32 0, %v97_v49  ;;  %v196_v54 = vadd.s32 %v195_v53, %v191_v51  ;;  %v120_v35 = vsel %vm35_vm14, %v119_v28, %v95_v42 }
  0xa6   :  { %v122_v37 = vsel %vm34_vm15, 0, %v120_v35 }
  0xa7   :  { %v509_v55 = vmin.u32 %v99_v52, %v97_v49  ;;  %v197_v56 = vadd.s32 536870912, %v196_v54  ;;  %v332_v40 = vadd.s32 3, %v122_v37  ;;  %v126_v45 = vand.u32 3, %v122_v37 }
  0xa9   :  { %v101_v57 = vclz %v509_v55  ;;  %v198_v58 = vshrl.u32 %v197_v56, 30  ;;  %v333_v44 = vand.u32 3, %v332_v40  ;;  %vm131_vm3 = vcmp.eq.s32.totalorder %v126_v45, 2 }
  0xaa   :  { %vm128_vm5 = vcmp.eq.s32.totalorder %v126_v45, 0  ;;  %vm127_vm7 = vcmp.lt.s32.totalorder %v126_v45, 2 }
  0xab   :  { %v510_v59 = vadd.s32 4294967294, %v101_v57  ;;  %v199_v60 = vshll.u32 %v198_v58, 30  ;;  %v222_v41 = vsub.s32 4, %v198_v58  ;;  %vm338_vm2 = vcmp.eq.s32.totalorder %v333_v44, 2 }
  0xac   :  { %vm335_vm4 = vcmp.eq.s32.totalorder %v333_v44, 0  ;;  %vm334_vm6 = vcmp.lt.s32.totalorder %v333_v44, 2 }
  0xad   :  { %vm511_vm12 = vcmp.lt.s32.totalorder %v510_v59, 0  ;;  %v200_v62 = vsub.s32 %v196_v54, %v199_v60  ;;  %v223_v42 = vsel %vm138_vm0, %v222_v41, %v198_v58 }
  0xae   :  { %v104_v61 = vsel %vm511_vm12, 0, %v510_v59 }
  0xaf   :  { %v105_v2 = vsub.s32 32, %v104_v61  ;;  %v109_v3 = vsub.s32 4294967266, %v104_v61  ;;  %v202_v4 = vsub.s32 0, %v200_v62  ;;  %v106_v7 = vshll.u32 %v97_v49, %v104_v61 }
  0xb0   :  { %v225_v49 = vsel %vm137_vm1, 0, %v223_v42 }
  0xb1   :  { %v107_v8 = vshrl.u32 %v89_v63, %v105_v2  ;;  %v110_v9 = vadd.s32 127, %v109_v3  ;;  %v513_v11 = vmin.u32 %v202_v4, %v200_v62  ;;  %v436_v55 = vadd.s32 3, %v225_v49 }
  0xb2   :  { %v229_v60 = vand.u32 3, %v225_v49 }
  0xb3   :  { %v108_v12 = vor.u32 %v107_v8, %v106_v7  ;;  %v111_v13 = vshll.u32 %v110_v9, 23  ;;  %v204_v14 = vclz %v513_v11  ;;  %v437_v61 = vand.u32 3, %v436_v55 }
  0xb4   :  { %vm234_vm10 = vcmp.eq.s32.totalorder %v229_v60, 2  ;;  %vm231_vm12 = vcmp.eq.s32.totalorder %v229_v60, 0 }
  0xb5   :  { %v112_v15 = vor.u32 4788187, %v111_v13  ;;  %v514_v16 = vadd.s32 4294967294, %v204_v14  ;;  %v115_v19 = vcvt.s32.f32 %v108_v12  ;;  %vm442_vm11 = vcmp.eq.s32.totalorder %v437_v61, 2 }
  0xb7   :  { %v113_v18 = vand.u32 2147483647, %v112_v15  ;;  %vm515_vm13 = vcmp.lt.s32.totalorder %v514_v16, 0 }
  0xb8   :  { %v207_v21 = vsel %vm515_vm13, 0, %v514_v16  ;;  %vm439_vm13 = vcmp.eq.s32.totalorder %v437_v61, 0 }
  0xb9   :  { %v116_v20 = vmul.f32 %v115_v19, %v113_v18  ;;  %v208_v0 = vsub.s32 32, %v207_v21  ;;  %v212_v1 = vsub.s32 4294967266, %v207_v21  ;;  %v209_v26 = vshll.u32 %v200_v62, %v207_v21 }
  0xbb   :  { %v117_v25 = vxor.u32 2147483648, %v116_v20  ;;  %v210_v22 = vshrl.u32 %v192_v23, %v208_v0  ;;  %v213_v27 = vadd.s32 127, %v212_v1 }
  0xbd   :  { %v118_v29 = vsel %vm35_vm14, %v117_v25, %v116_v20  ;;  %v211_v31 = vor.u32 %v210_v22, %v209_v26  ;;  %v214_v32 = vshll.u32 %v213_v27, 23  ;;  %vm230_vm14 = vcmp.lt.s32.totalorder %v229_v60, 2 }
  0xbe   :  { %v121_v30 = vsel %vm34_vm15, %v619_v5, %v118_v29  ;;  %vm438_vm15 = vcmp.lt.s32.totalorder %v437_v61, 2 }
  0xbf   :  { %553 = vcosq.f32 %v121_v30  ;;  %v215_v33 = vor.u32 4788187, %v214_v32  ;;  %v218_v34 = vcvt.s32.f32 %v211_v31 }
  0xc0   :  { %555 = vsinq.f32 %v121_v30 }
  0xc1   :  { %v216_v36 = vand.u32 2147483647, %v215_v33 }
  0xc3   :  { %v219_v38 = vmul.f32 %v218_v34, %v216_v36 }
  0xc5   :  { %v220_v39 = vxor.u32 2147483648, %v219_v38 }
  0xc7   :  { %v221_v6 = vsel %vm138_vm0, %v220_v39, %v219_v38  ;;  %vm228_vm0 = vweird.f32 %v623_v10 }
  0xc8   :  { %v224_v43 = vsel %vm137_vm1, %v623_v10, %v221_v6  ;;  %vm465_vm1 = vcmask 519424  }
  0xc9   :  { %557 = vcosq.f32 %v224_v43 }
  0xca   :  { %559 = vsinq.f32 %v224_v43 }
  0xcc   :  { %v554_v46 = vpop.eup %553 }
  0xcd   :  { %v556_v47 = vpop.eup %555  ;;  %v132_v24 = vxor.u32 2147483648, %v554_v46 }
  0xce   :  { %v129_v48 = vxor.u32 2147483648, %v556_v47 }
  0xcf   :  { %v340_v50 = vsel %vm338_vm2, %v132_v24, %v556_v47  ;;  %v133_v51 = vsel %vm131_vm3, %v132_v24, %v556_v47  ;;  %vm479_vm2 = vcmask 781824   ;;  %vm488_vm3 = vcmask 1044224  }
  0xd0   :  { %v337_v17 = vsel %vm335_vm4, %v554_v46, %v129_v48  ;;  %v130_v52 = vsel %vm128_vm5, %v554_v46, %v129_v48 }
  0xd1   :  { %v341_v53 = vsel %vm334_vm6, %v337_v17, %v340_v50  ;;  %v134_v54 = vsel %vm127_vm7, %v130_v52, %v133_v51 }
  0xd2   :  { %v342_v56 = vsel %vm125_vm8, nan, %v341_v53  ;;  %v135_v57 = vsel %vm125_vm8, nan, %v134_v54 }
  0xd3   :  { %v530_v58 = vpack.c.bf16 %v342_v56, %v342_v56  ;;  %v528_v59 = vpack.c.bf16 %v135_v57, %v135_v57 }
  0xd5   :  { %473 = vrot.lane.b32.xlu0 %v530_v58, %s590_s0  ;;  %459 = vrot.lane.b32.xlu1 %v528_v59, %s591_s1  ;;  %457 = vst.msk [vmem:[#allocation2] sm:$0xf] %vm456_vm9, %v528_v59 }
  0xd6   :  { %v558_v62 = vpop.eup %557 }
  0xd7   :  { %v560_v63 = vpop.eup %559  ;;  %v235_v5 = vxor.u32 2147483648, %v558_v62 }
  0xd8   :  { %v232_v2 = vxor.u32 2147483648, %v560_v63 }
  0xd9   :  { %482 = vrot.lane.b32.xlu0 %v530_v58, %s592_s15  ;;  %v236_v3 = vsel %vm234_vm10, %v235_v5, %v560_v63  ;;  %v444_v4 = vsel %vm442_vm11, %v235_v5, %v560_v63 }
  0xda   :  { %v233_v7 = vsel %vm231_vm12, %v558_v62, %v232_v2  ;;  %v441_v8 = vsel %vm439_vm13, %v558_v62, %v232_v2 }
  0xdb   :  { %v237_v9 = vsel %vm230_vm14, %v233_v7, %v236_v3  ;;  %v445_v11 = vsel %vm438_vm15, %v441_v8, %v444_v4 }
  0xdc   :  { %v238_v12 = vsel %vm228_vm0, nan, %v237_v9  ;;  %v446_v14 = vsel %vm228_vm0, nan, %v445_v11 }
  0xdd   :  { %v529_v13 = vpack.c.bf16 %v238_v12, %v238_v12  ;;  %v531_v15 = vpack.c.bf16 %v446_v14, %v446_v14 }
  0xdf   :  { %461 = vrot.lane.b32.xlu1 %v529_v13, %s591_s1  ;;  %458 = vst.msk [vmem:[#allocation2 + $0x4] sm:$0xf] %vm456_vm9, %v529_v13 }
  0xe3   :  { %475 = vrot.lane.b32.xlu1 %v531_v15, %s590_s0 }
  0xe7   :  { %484 = vrot.lane.b32.xlu1 %v531_v15, %s592_s15 }
 0x147   :  { %v460_v16 = vpop.permute.xlu1 %459  ;;  %v474_v18 = vpop.permute.xlu0 %473 }
 0x148   :  { %466 = vst.msk [vmem:[#allocation2] sm:$0xf] %vm465_vm1, %v460_v16 }
 0x149   :  { %480 = vst.msk [vmem:[#allocation2] sm:$0xf] %vm479_vm2, %v474_v18 }
 0x14b   :  { %v483_v10 = vpop.permute.xlu0 %482 }
 0x14c   :  { %489 = vst.msk [vmem:[#allocation2] sm:$0xf] %vm488_vm3, %v483_v10 }
 0x151   :  { %v462_v19 = vpop.permute.xlu1 %461 }
 0x152   :  { %467 = vst.msk [vmem:[#allocation2 + $0x4] sm:$0xf] %vm465_vm1, %v462_v19 }
 0x155   :  { %v476_v20 = vpop.permute.xlu1 %475 }
 0x156   :  { %481 = vst.msk [vmem:[#allocation2 + $0x4] sm:$0xf] %vm479_vm2, %v476_v20 }
 0x159   :  { %v485_v21 = vpop.permute.xlu1 %484 }
 0x15a   :  { %490 = vst.msk [vmem:[#allocation2 + $0x4] sm:$0xf] %vm488_vm3, %v485_v21 }
 0x15b   :  { %572 = shalt.err (!%p569_p4)
}
 0x15c   :  { %s594_s19 = smov 4  }
 0x15d   :  { %502 = dma.vmem_to_hbm [thread:$0]  %s497_s17, 128, %s690_s2, [#allocation3], %s590_s0, %s590_s0, %s594_s19  }
 0x15e   :  { %581 = dma.done.wait [#allocation3], 128  }
 0x15f   :  { %582 = vsyncadd [#allocation3], 4294967168 }
 0x160   :  { %506 = vsyncpa [#allocation3], 1 }

</bundles_post_ra>
